<compile_context>
chip_gen: v7x
topology: tpu7x:2x2x1
jax: 0.10.0
libtpu: 0.0.40
codegen_flags: <defaults>
</compile_context>

<pallas_src>
import jax
import jax.numpy as jnp
from jax.experimental import pallas as pl
from jax.experimental.pallas import tpu as pltpu

batch_size = 5
hidden_size = 2
input_size = 4


def rnn_cell_kernel(x_ref, w_ref, out_ref):
    # x_ref: (B, K)   activation (unpadded; Mosaic pads in vregs)
    # w_ref: (K, H)   weight, pre-transposed to (in_features, out_features)
    # out_ref: (B, H) logical output
    acc = jnp.dot(x_ref[...], w_ref[...], preferred_element_type=jnp.float32)
    out_ref[...] = jnp.tanh(acc).astype(out_ref.dtype)


def rnn_cell_forward(x, w_ih_t):
    # h_prev is always zeros in the reference forward, so the hh(h_prev) term
    # is elided (see module-level note).
    b = x.shape[0]
    h_f = w_ih_t.shape[1]
    return pl.pallas_call(
        rnn_cell_kernel,
        out_shape=jax.ShapeDtypeStruct((b, h_f), jnp.float32),
        in_specs=[
            pl.BlockSpec(memory_space=pltpu.VMEM),
            pl.BlockSpec(memory_space=pltpu.VMEM),
        ],
        out_specs=pl.BlockSpec(memory_space=pltpu.VMEM),
    )(x, w_ih_t)


def init_params(key):
    # Deterministic init mimicking nn.Linear default: U(-1/sqrt(fan_in), 1/sqrt(fan_in))
    k_ih, k_hh = jax.random.split(key)
    bound_ih = 1.0 / jnp.sqrt(jnp.float32(input_size))
    bound_hh = 1.0 / jnp.sqrt(jnp.float32(hidden_size))
    w_ih = jax.random.uniform(
        k_ih, (hidden_size, input_size), jnp.float32, -bound_ih, bound_ih
    )
    w_hh = jax.random.uniform(
        k_hh, (hidden_size, hidden_size), jnp.float32, -bound_hh, bound_hh
    )
    # One-time layout prep (hoisted out of the forward path): the kernel wants
    # the weight in (in_features, out_features) layout.
    w_ih_t = jnp.asarray(w_ih.T, jnp.float32)
    return w_ih, w_hh, w_ih_t


if __name__ == "__main__":
    key = jax.random.PRNGKey(0)
    k_params, k_x = jax.random.split(key)
    w_ih, w_hh, w_ih_t = init_params(k_params)
    x = jax.random.normal(k_x, (batch_size, input_size), jnp.float32)

    h = rnn_cell_forward(x, w_ih_t)
    h = jax.block_until_ready(h)

    # Reference check in plain JAX (same math as the PyTorch forward).
    h_prev = jnp.zeros((batch_size, hidden_size), jnp.float32)
    h_ref = jnp.tanh(x @ w_ih.T + h_prev @ w_hh.T)
    assert h.shape == (batch_size, hidden_size)
    assert jnp.allclose(h, h_ref, atol=1e-5, rtol=1e-5)

    print("KERNEL_OK")
</pallas_src>

<mosaic_0001>
module attributes {stable_mosaic.version = 11 : i64} {
  func.func @rnn_cell_kernel(%arg0: memref<5x4xf32, #tpu.memory_space<vmem>>, %arg1: memref<4x2xf32, #tpu.memory_space<vmem>>, %arg2: memref<5x2xf32, #tpu.memory_space<vmem>>) attributes {dimension_semantics = [], scalar_prefetch = 0 : i64, scratch_operands = 0 : i64, tpu.core_type = #tpu.core_type<tc>} {
    %c0 = arith.constant 0 : index
    %c0_0 = arith.constant 0 : index
    %0 = vector.load %arg0[%c0, %c0_0] : memref<5x4xf32, #tpu.memory_space<vmem>>, vector<5x4xf32>
    %c0_1 = arith.constant 0 : index
    %c0_2 = arith.constant 0 : index
    %1 = vector.load %arg1[%c0_1, %c0_2] : memref<4x2xf32, #tpu.memory_space<vmem>>, vector<4x2xf32>
    %cst = arith.constant dense<0.000000e+00> : vector<5x2xf32>
    %2 = tpu.matmul %0, %1, %cst {dimension_numbers = #tpu.dot_dimension_numbers<[1], [0], [0], [1], [0, 0, 1, 1], [], []>} : vector<5x4xf32>, vector<4x2xf32>, vector<5x2xf32> -> vector<5x2xf32>
    %3 = math.tanh %2 : vector<5x2xf32>
    %c0_3 = arith.constant 0 : index
    %c0_4 = arith.constant 0 : index
    %4 = vector.load %arg2[%c0_3, %c0_4] : memref<5x2xf32, #tpu.memory_space<vmem>>, vector<5x2xf32>
    tpu.vector_store %arg2[%c0_3, %c0_4], %3 {strides = array<i32>} : memref<5x2xf32, #tpu.memory_space<vmem>>, vector<5x2xf32>,
    return
  }
}

</mosaic_0001>

<bundles_post_ra>
// kernel: tpu_custom_call.1
= control target key start
LH: loop header
LB: loop body
LE: loop exit
PB: predicated region body
PF: predicated region fallthrough
CT: control target
= control target key end

     0   :  { %vm17_vm0 = vcmask 1043456   ;;  %vm13_vm1 = vcmask 31744   ;;  %v111_v0 = vmov 0.0   ;;  %vm112_vm2 = vmmov 0   ;;  %s137_s1 = inlined_call_operand.vmem [shape: f32[4,2], index: 1, kind: input, shape index: {}]   ;;  %s138_s0 = inlined_call_operand.vmem [shape: f32[5,4], index: 0, kind: input, shape index: {}]   ;;  %s139_s2 = inlined_call_operand.vmem [shape: f32[5,2], index: 2, kind: output, shape index: {}]  }
   0x1   :  { %102 = vmatprep.subr.mxu0 %v111_v0  ;;  %v12_v1 = vld [vmem:[%s137_s1] sm:$0xf]  ;;  %104 = vmatprep.mubr.msk.f32.mxu0 %vm112_vm2, %v111_v0  ;;  %vm92_vm3 = vcmask 12288  }
   0x2   :  { %v11_v2 = vld [vmem:[%s138_s0] sm:$0x1f]  ;;  %103 = vmatpush3.msk.msra.mxu0 %vm17_vm0, %v12_v1 }
   0x3   :  { %105 = vmatmul.mubr.msk.f32.vlgmr.msra.gmra.mrb[0].mxu0 %vm13_vm1, %v11_v2 }
  0xd6   :  { %v87_v3 = vpop.f32.mrb[0].mxu0 }
  0xd7   :  { %109 = vtanh.f32 %v87_v3  ;;  %v106_v4 = vpop.f32.mrb[1].mxu0 }
  0xe1   :  { %v110_v5 = vpop.eup %109 }
  0xe2   :  { %93 = vst.msk [vmem:[%s139_s2] sm:$0x1f] %vm92_vm3, %v110_v5 }

</bundles_post_ra>
